<compile_context>
chip_gen: v7x
topology: tpu7x:2x2x1
jax: 0.10.0
libtpu: 0.0.40
codegen_flags: <defaults>
</compile_context>

<pallas_src>
import functools

import jax
import jax.numpy as jnp
from jax.experimental import pallas as pl
from jax.experimental.pallas import tpu as pltpu

EPS = 1e-5                       # PyTorch InstanceNorm3d default
_FUSED_VMEM_BUDGET = 40 << 20    # gate for the single-pass path (headroom under v7x 64 MiB)
_VMEM_LIMIT = 48 << 20           # scoped VMEM limit handed to Mosaic (safe on v5e/v6e/v7x)


def _round_up(x, m):
    return (x + m - 1) // m * m


# ---------------------- fused kernel: conv + InstanceNorm + ReLU ----------------------
def fused_conv_in_relu_kernel(patches_ref, w_ref, gamma_ref, beta_ref, o_ref,
                              sum_sc, sq_sc, *, p_valid, tp):
    """Per P tile: conv-as-matmul into the resident (C, P_pad) output block + stats.
    On the last P tile: fused InstanceNorm affine + ReLU applied in place.

    patches_ref: (1, K_pad, TP) bf16     w_ref: (C, K_pad) bf16
    gamma/beta : (C, 1) f32              o_ref: (1, C, P_pad) out dtype (resident over P)
    """
    pt = pl.program_id(1)

    @pl.when(pt == 0)
    def _():
        sum_sc[...] = jnp.zeros_like(sum_sc)
        sq_sc[...] = jnp.zeros_like(sq_sc)

    # (C, TP) = (C, K_pad) @ (K_pad, TP); f32 accumulation on the MXU, lane-dense output.
    y = jnp.dot(w_ref[...], patches_ref[0], preferred_element_type=jnp.float32)
    off = pl.multiple_of(pt * tp, tp)
    o_ref[0, :, pl.ds(off, tp)] = y.astype(o_ref.dtype)

    # Padded P columns are exact zeros (W @ 0 == 0) so they do not bias the stats.
    sum_sc[...] += jnp.sum(y, axis=-1, keepdims=True)             # (C, 1)
    sq_sc[...] += jnp.sum(y * y, axis=-1, keepdims=True)          # (C, 1)

    @pl.when(pt == pl.num_programs(1) - 1)
    def _():
        inv_p = 1.0 / p_valid
        mean = sum_sc[...] * inv_p
        var = jnp.maximum(sq_sc[...] * inv_p - mean * mean, 0.0)  # clamp: cancellation guard
        rstd = jax.lax.rsqrt(var + EPS)
        scale = rstd * gamma_ref[...]                              # (C, 1)
        shift = beta_ref[...] - mean * scale
        y_full = o_ref[0].astype(jnp.float32)                      # (C, P_pad), stays in VMEM
        o_ref[0] = jnp.maximum(y_full * scale + shift, 0.0).astype(o_ref.dtype)


# -------------------- two-pass fallback kernels (large P per sample) -------------------
def conv_stats_kernel(patches_ref, w_ref, gamma_ref, beta_ref,
                      y_ref, scale_ref, shift_ref, sum_sc, sq_sc, *, p_valid):
    """Fallback pass 1: conv matmul per P tile (bf16 raw y out) + per-channel stats."""
    pt = pl.program_id(1)

    @pl.when(pt == 0)
    def _():
        sum_sc[...] = jnp.zeros_like(sum_sc)
        sq_sc[...] = jnp.zeros_like(sq_sc)

    y = jnp.dot(w_ref[...], patches_ref[0], preferred_element_type=jnp.float32)
    y_ref[0] = y.astype(y_ref.dtype)
    sum_sc[...] += jnp.sum(y, axis=-1, keepdims=True)
    sq_sc[...] += jnp.sum(y * y, axis=-1, keepdims=True)

    @pl.when(pt == pl.num_programs(1) - 1)
    def _():
        inv_p = 1.0 / p_valid
        mean = sum_sc[...] * inv_p
        var = jnp.maximum(sq_sc[...] * inv_p - mean * mean, 0.0)
        scale = jax.lax.rsqrt(var + EPS) * gamma_ref[...]
        # TODO(synk): lane-dense scale/shift (1-lane masked stores; tiny volume, cleanliness only).
        scale_ref[0] = scale
        shift_ref[0] = beta_ref[...] - mean * scale


def norm_relu_kernel(y_ref, scale_ref, shift_ref, o_ref):
    """Fallback pass 2: y * scale + shift, ReLU; lane-dense (C, TP) tiles."""
    y = y_ref[0].astype(jnp.float32)
    o_ref[0] = jnp.maximum(y * scale_ref[0] + shift_ref[0], 0.0).astype(o_ref.dtype)


# ------------------------------ glue (plain JAX) ---------------------------------------
def _im2col_3d_T(x, ksize, stride, pad, k_pad, p_pad):
    """x: (N,C,D,H,W) -> bf16 patches^T (N, K_pad, P_pad); K ordered (ci, kd, kh, kw)."""
    N, C, D, H, W = x.shape
    x = x.astype(jnp.bfloat16)                     # cast BEFORE the 27x expansion
    xp = jnp.pad(x, ((0, 0), (0, 0), (pad, pad), (pad, pad), (pad, pad)))
    Do = (D + 2 * pad - ksize) // stride + 1
    Ho = (H + 2 * pad - ksize) // stride + 1
    Wo = (W + 2 * pad - ksize) // stride + 1
    P = Do * Ho * Wo
    cols = []
    for kd in range(ksize):
        for kh in range(ksize):
            for kw in range(ksize):
                patch = xp[:, :,
                           kd:kd + Do * stride:stride,
                           kh:kh + Ho * stride:stride,
                           kw:kw + Wo * stride:stride]          # (N, C, Do, Ho, Wo)
                cols.append(patch.reshape(N, C, P))
    patchesT = jnp.stack(cols, axis=2).reshape(N, C * ksize ** 3, P)
    return jnp.pad(patchesT, ((0, 0), (0, k_pad - C * ksize ** 3), (0, p_pad - P)))


def _two_pass_conv_block(patchesT, w2, gamma2, beta2, patches_spec, *,
                         n_pt, tp, p_pad, p_valid, out_dtype):
    """Fallback when the per-sample (C_out, P_pad) output does not fit VMEM."""
    N, K_pad, _ = patchesT.shape
    C_out = w2.shape[0]

    y_raw, scale, shift = pl.pallas_call(
        functools.partial(conv_stats_kernel, p_valid=float(p_valid)),
        out_shape=(jax.ShapeDtypeStruct((N, C_out, p_pad), jnp.bfloat16),
                   jax.ShapeDtypeStruct((N, C_out, 1), jnp.float32),
                   jax.ShapeDtypeStruct((N, C_out, 1), jnp.float32)),
        grid_spec=pltpu.PrefetchScalarGridSpec(
            num_scalar_prefetch=0,
            grid=(N, n_pt),                          # P (stats) axis last
            in_specs=[patches_spec,
                      pl.BlockSpec((C_out, K_pad), lambda n, p: (0, 0)),
                      pl.BlockSpec((C_out, 1), lambda n, p: (0, 0)),
                      pl.BlockSpec((C_out, 1), lambda n, p: (0, 0))],
            out_specs=[pl.BlockSpec((1, C_out, tp), lambda n, p: (n, 0, p)),
                       pl.BlockSpec((1, C_out, 1), lambda n, p: (n, 0, 0)),
                       pl.BlockSpec((1, C_out, 1), lambda n, p: (n, 0, 0))],
            scratch_shapes=[pltpu.VMEM((C_out, 1), jnp.float32),
                            pltpu.VMEM((C_out, 1), jnp.float32)],
        ),
        compiler_params=pltpu.CompilerParams(
            dimension_semantics=("parallel", "arbitrary"),
            vmem_limit_bytes=_VMEM_LIMIT),
    )(patchesT, w2, gamma2, beta2)

    return pl.pallas_call(
        norm_relu_kernel,
        out_shape=jax.ShapeDtypeStruct((N, C_out, p_pad), out_dtype),
        grid_spec=pltpu.PrefetchScalarGridSpec(
            num_scalar_prefetch=0,
            grid=(N, n_pt),
            in_specs=[pl.BlockSpec((1, C_out, tp), lambda n, p: (n, 0, p)),
                      pl.BlockSpec((1, C_out, 1), lambda n, p: (n, 0, 0)),
                      pl.BlockSpec((1, C_out, 1), lambda n, p: (n, 0, 0))],
            out_specs=pl.BlockSpec((1, C_out, tp), lambda n, p: (n, 0, p)),
        ),
        compiler_params=pltpu.CompilerParams(
            dimension_semantics=("parallel", "parallel"),
            vmem_limit_bytes=_VMEM_LIMIT),
    )(y_raw, scale, shift)


def conv_block(x, weight, gamma, beta, stride, out_dtype=jnp.float32):
    """Conv3d(k=3, pad=1, bias=False) + InstanceNorm3d(affine=True) + ReLU."""
    N, C_in, D, H, W = x.shape
    C_out = weight.shape[0]
    Do = (D + 2 - 3) // stride + 1
    Ho = (H + 2 - 3) // stride + 1
    Wo = (W + 2 - 3) // stride + 1
    P = Do * Ho * Wo
    K = C_in * 27

    K_pad = _round_up(K, 16)                         # bf16 sublane pack; block = full K dim
    TP = min(1024, _round_up(P, 128))                # P tile (lane-dense, multiple of 128)
    P_pad = _round_up(P, TP)
    n_pt = P_pad // TP
    out_size = jnp.dtype(out_dtype).itemsize

    patchesT = _im2col_3d_T(x, 3, stride, 1, K_pad, P_pad)            # (N, K_pad, P_pad) bf16
    w2 = jnp.pad(weight.astype(jnp.bfloat16).reshape(C_out, K), ((0, 0), (0, K_pad - K)))
    gamma2 = gamma.reshape(C_out, 1).astype(jnp.float32)
    beta2 = beta.reshape(C_out, 1).astype(jnp.float32)

    # Deeper pipelining on the streaming patches operand when there are enough P tiles.
    n_buf = 3 if n_pt >= 3 else 2
    if n_buf > 2:
        patches_spec = pl.BlockSpec((1, K_pad, TP), lambda n, p: (n, 0, p),
                                    pipeline_mode=pl.Buffered(n_buf))
    else:
        patches_spec = pl.BlockSpec((1, K_pad, TP), lambda n, p: (n, 0, p))

    # VMEM estimate for the fused single-pass path (patch buffers + W + resident output x2).
    fused_vmem = (n_buf * K_pad * TP * 2 + 2 * C_out * K_pad * 2
                  + 2 * C_out * P_pad * out_size + 8 * C_out * 4 + (1 << 16))

    flops = 2 * N * C_out * K_pad * P_pad + 6 * N * C_out * P_pad
    bytes_accessed = (N * K_pad * P_pad * 2 + C_out * K_pad * 2
                      + N * C_out * P_pad * out_size + 2 * C_out * 4)

    if fused_vmem <= _FUSED_VMEM_BUDGET:
        out = pl.pallas_call(
            functools.partial(fused_conv_in_relu_kernel, p_valid=float(P), tp=TP),
            out_shape=jax.ShapeDtypeStruct((N, C_out, P_pad), out_dtype),
            grid_spec=pltpu.PrefetchScalarGridSpec(
                num_scalar_prefetch=0,
                grid=(N, n_pt),                              # P (stats) axis last
                in_specs=[
                    patches_spec,
                    pl.BlockSpec((C_out, K_pad), lambda n, p: (0, 0)),
                    pl.BlockSpec((C_out, 1), lambda n, p: (0, 0)),
                    pl.BlockSpec((C_out, 1), lambda n, p: (0, 0)),
                ],
                out_specs=pl.BlockSpec((1, C_out, P_pad), lambda n, p: (n, 0, 0)),
                scratch_shapes=[pltpu.VMEM((C_out, 1), jnp.float32),
                                pltpu.VMEM((C_out, 1), jnp.float32)],
            ),
            compiler_params=pltpu.CompilerParams(
                dimension_semantics=("parallel", "arbitrary"),
                vmem_limit_bytes=_VMEM_LIMIT),
            cost_estimate=pl.CostEstimate(flops=flops, transcendentals=N * C_out,
                                          bytes_accessed=bytes_accessed),
        )(patchesT, w2, gamma2, beta2)
    else:
        out = _two_pass_conv_block(patchesT, w2, gamma2, beta2, patches_spec,
                                   n_pt=n_pt, tp=TP, p_pad=P_pad, p_valid=P,
                                   out_dtype=out_dtype)

    # (N, C_out, P_pad) -> drop P padding -> NCDHW (pure reshape, no transpose).
    return out[:, :, :P].reshape(N, C_out, Do, Ho, Wo)


def downsample_block(x, params, out_dtype=jnp.float32):
    """Equivalent of DownsampleBlock.forward: conv1(stride=2) then conv2(stride=1).
    The block-to-block activation stays bf16; only the final block output is f32."""
    x = conv_block(x, params["w1"], params["g1"], params["b1"], stride=2,
                   out_dtype=jnp.bfloat16)
    x = conv_block(x, params["w2"], params["g2"], params["b2"], stride=1,
                   out_dtype=out_dtype)
    return x


# ------------------------------- reference ---------------------------------------------
def ref_conv_block(x, weight, gamma, beta, stride):
    y = jax.lax.conv_general_dilated(
        x, weight, window_strides=(stride,) * 3, padding=[(1, 1)] * 3,
        dimension_numbers=("NCDHW", "OIDHW", "NCDHW"))
    mean = y.mean(axis=(2, 3, 4), keepdims=True)
    var = ((y - mean) ** 2).mean(axis=(2, 3, 4), keepdims=True)
    yn = (y - mean) / jnp.sqrt(var + EPS)
    yn = yn * gamma.reshape(1, -1, 1, 1, 1) + beta.reshape(1, -1, 1, 1, 1)
    return jnp.maximum(yn, 0.0)


def ref_downsample_block(x, params):
    x = ref_conv_block(x, params["w1"], params["g1"], params["b1"], stride=2)
    x = ref_conv_block(x, params["w2"], params["g2"], params["b2"], stride=1)
    return x


# --------------------------------- main -------------------------------------------------
if __name__ == "__main__":
    key = jax.random.PRNGKey(0)
    N, C_in, C_out, S = 2, 4, 8, 16                     # small shapes
    k_x, k_w1, k_w2, k_g1, k_b1, k_g2, k_b2 = jax.random.split(key, 7)

    x = jax.random.normal(k_x, (N, C_in, S, S, S), dtype=jnp.float32)

    # Deterministic synthetic parameters (Conv3d bias=False since norm != 'none')
    params = {
        "w1": jax.random.normal(k_w1, (C_out, C_in, 3, 3, 3), dtype=jnp.float32) * 0.1,
        "g1": 1.0 + 0.1 * jax.random.normal(k_g1, (C_out,), dtype=jnp.float32),
        "b1": 0.1 * jax.random.normal(k_b1, (C_out,), dtype=jnp.float32),
        "w2": jax.random.normal(k_w2, (C_out, C_out, 3, 3, 3), dtype=jnp.float32) * 0.1,
        "g2": 1.0 + 0.1 * jax.random.normal(k_g2, (C_out,), dtype=jnp.float32),
        "b2": 0.1 * jax.random.normal(k_b2, (C_out,), dtype=jnp.float32),
    }

    out = jax.block_until_ready(jax.jit(downsample_block)(x, params))
    ref = jax.block_until_ready(ref_downsample_block(x, params))

    assert out.shape == (N, C_out, S // 2, S // 2, S // 2), out.shape
    assert out.dtype == jnp.float32, out.dtype
    # bf16 MXU operands + bf16 intermediate memory path -> slightly looser tolerance.
    max_err = float(jnp.max(jnp.abs(out - ref)))
    assert jnp.allclose(out, ref, atol=6e-2, rtol=6e-2), max_err

    print("KERNEL_OK")
</pallas_src>

<mosaic_0001>
module attributes {stable_mosaic.version = 11 : i64} {
  func.func @fused_conv_in_relu_kernel(%arg0: i32, %arg1: i32, %arg2: memref<1x112x512xbf16, #tpu.memory_space<vmem>>, %arg3: memref<8x112xbf16, #tpu.memory_space<vmem>>, %arg4: memref<8x1xf32, #tpu.memory_space<vmem>>, %arg5: memref<8x1xf32, #tpu.memory_space<vmem>>, %arg6: memref<1x8x512xbf16, #tpu.memory_space<vmem>>, %arg7: memref<8x1xf32, #tpu.memory_space<vmem>>, %arg8: memref<8x1xf32, #tpu.memory_space<vmem>>) attributes {dimension_semantics = [#tpu.dimension_semantics<parallel>, #tpu.dimension_semantics<arbitrary>], iteration_bounds = array<i64: 2, 1>, scalar_prefetch = 0 : i64, scratch_operands = 2 : i64, tpu.core_type = #tpu.core_type<tc>, window_params = [{transform_indices = @transform_0, window_bounds = array<i64: 1, 112, 512>}, {pipeline_mode = #tpu.pipeline_mode<synchronous>, transform_indices = @transform_1, window_bounds = array<i64: 8, 112>}, {pipeline_mode = #tpu.pipeline_mode<synchronous>, transform_indices = @transform_2, window_bounds = array<i64: 8, 1>}, {pipeline_mode = #tpu.pipeline_mode<synchronous>, transform_indices = @transform_3, window_bounds = array<i64: 8, 1>}, {transform_indices = @transform_4, window_bounds = array<i64: 1, 8, 512>}]} {
    %c0_i32 = arith.constant 0 : i32
    %0 = arith.cmpi eq, %arg1, %c0_i32 : i32
    %1 = arith.extui %0 : i1 to i32
    %c0_i32_0 = arith.constant 0 : i32
    %2 = arith.cmpi ne, %1, %c0_i32_0 : i32
    scf.if %2 {
      %cst_19 = arith.constant 0.000000e+00 : f32
      %28 = vector.broadcast %cst_19 : f32 to vector<8x1xf32>
      %c0_20 = arith.constant 0 : index
      %c0_21 = arith.constant 0 : index
      %29 = vector.load %arg7[%c0_20, %c0_21] : memref<8x1xf32, #tpu.memory_space<vmem>>, vector<8x1xf32>
      tpu.vector_store %arg7[%c0_20, %c0_21], %28 {strides = array<i32>} : memref<8x1xf32, #tpu.memory_space<vmem>>, vector<8x1xf32>,
      %cst_22 = arith.constant 0.000000e+00 : f32
      %30 = vector.broadcast %cst_22 : f32 to vector<8x1xf32>
      %c0_23 = arith.constant 0 : index
      %c0_24 = arith.constant 0 : index
      %31 = vector.load %arg8[%c0_23, %c0_24] : memref<8x1xf32, #tpu.memory_space<vmem>>, vector<8x1xf32>
      tpu.vector_store %arg8[%c0_23, %c0_24], %30 {strides = array<i32>} : memref<8x1xf32, #tpu.memory_space<vmem>>, vector<8x1xf32>,
    } else {
    }
    %c0 = arith.constant 0 : index
    %c0_1 = arith.constant 0 : index
    %3 = vector.load %arg3[%c0, %c0_1] : memref<8x112xbf16, #tpu.memory_space<vmem>>, vector<8x112xbf16>
    %c0_2 = arith.constant 0 : index
    %c0_3 = arith.constant 0 : index
    %c0_4 = arith.constant 0 : index
    %4 = vector.load %arg2[%c0_2, %c0_3, %c0_4] : memref<1x112x512xbf16, #tpu.memory_space<vmem>>, vector<1x112x512xbf16>
    %5 = vector.shape_cast %4 : vector<1x112x512xbf16> to vector<112x512xbf16>
    %cst = arith.constant dense<0.000000e+00> : vector<8x512xf32>
    %6 = tpu.matmul %3, %5, %cst {dimension_numbers = #tpu.dot_dimension_numbers<[1], [0], [0], [1], [0, 0, 1, 1], [], []>} : vector<8x112xbf16>, vector<112x512xbf16>, vector<8x512xf32> -> vector<8x512xf32>
    %c512_i32 = arith.constant 512 : i32
    %7 = arith.muli %arg1, %c512_i32 : i32
    %8 = tpu.assume_multiple %7, 512 : i32
    %9 = arith.truncf %6 : vector<8x512xf32> to vector<8x512xbf16>
    %c0_5 = arith.constant 0 : index
    %c0_6 = arith.constant 0 : index
    %10 = arith.index_cast %8 : i32 to index
    %11 = vector.load %arg6[%c0_5, %c0_6, %10] : memref<1x8x512xbf16, #tpu.memory_space<vmem>>, vector<1x8x512xbf16>
    %12 = vector.shape_cast %11 : vector<1x8x512xbf16> to vector<8x512xbf16>
    %13 = vector.shape_cast %9 : vector<8x512xbf16> to vector<1x8x512xbf16>
    tpu.vector_store %arg6[%c0_5, %c0_6, %10], %13 {strides = array<i32>} : memref<1x8x512xbf16, #tpu.memory_space<vmem>>, vector<1x8x512xbf16>,
    %c0_7 = arith.constant 0 : index
    %c0_8 = arith.constant 0 : index
    %14 = vector.load %arg7[%c0_7, %c0_8] : memref<8x1xf32, #tpu.memory_space<vmem>>, vector<8x1xf32>
    %cst_9 = arith.constant dense<0.000000e+00> : vector<8xf32>
    %15 = vector.multi_reduction <add>, %6, %cst_9 [1] : vector<8x512xf32> to vector<8xf32>
    %16 = vector.shape_cast %15 : vector<8xf32> to vector<8x1xf32>
    %17 = arith.addf %14, %16 : vector<8x1xf32>
    %c0_10 = arith.constant 0 : index
    %c0_11 = arith.constant 0 : index
    %18 = vector.load %arg7[%c0_10, %c0_11] : memref<8x1xf32, #tpu.memory_space<vmem>>, vector<8x1xf32>
    tpu.vector_store %arg7[%c0_10, %c0_11], %17 {strides = array<i32>} : memref<8x1xf32, #tpu.memory_space<vmem>>, vector<8x1xf32>,
    %c0_12 = arith.constant 0 : index
    %c0_13 = arith.constant 0 : index
    %19 = vector.load %arg8[%c0_12, %c0_13] : memref<8x1xf32, #tpu.memory_space<vmem>>, vector<8x1xf32>
    %20 = arith.mulf %6, %6 : vector<8x512xf32>
    %cst_14 = arith.constant dense<0.000000e+00> : vector<8xf32>
    %21 = vector.multi_reduction <add>, %20, %cst_14 [1] : vector<8x512xf32> to vector<8xf32>
    %22 = vector.shape_cast %21 : vector<8xf32> to vector<8x1xf32>
    %23 = arith.addf %19, %22 : vector<8x1xf32>
    %c0_15 = arith.constant 0 : index
    %c0_16 = arith.constant 0 : index
    %24 = vector.load %arg8[%c0_15, %c0_16] : memref<8x1xf32, #tpu.memory_space<vmem>>, vector<8x1xf32>
    tpu.vector_store %arg8[%c0_15, %c0_16], %23 {strides = array<i32>} : memref<8x1xf32, #tpu.memory_space<vmem>>, vector<8x1xf32>,
    %c0_i32_17 = arith.constant 0 : i32
    %25 = arith.cmpi eq, %arg1, %c0_i32_17 : i32
    %26 = arith.extui %25 : i1 to i32
    %c0_i32_18 = arith.constant 0 : i32
    %27 = arith.cmpi ne, %26, %c0_i32_18 : i32
    scf.if %27 {
      %c0_19 = arith.constant 0 : index
      %c0_20 = arith.constant 0 : index
      %28 = vector.load %arg7[%c0_19, %c0_20] : memref<8x1xf32, #tpu.memory_space<vmem>>, vector<8x1xf32>
      %cst_21 = arith.constant 0.001953125 : f32
      %29 = vector.broadcast %cst_21 : f32 to vector<8x1xf32>
      %30 = arith.mulf %28, %29 : vector<8x1xf32>
      %c0_22 = arith.constant 0 : index
      %c0_23 = arith.constant 0 : index
      %31 = vector.load %arg8[%c0_22, %c0_23] : memref<8x1xf32, #tpu.memory_space<vmem>>, vector<8x1xf32>
      %cst_24 = arith.constant 0.001953125 : f32
      %32 = vector.broadcast %cst_24 : f32 to vector<8x1xf32>
      %33 = arith.mulf %31, %32 : vector<8x1xf32>
      %34 = arith.mulf %30, %30 : vector<8x1xf32>
      %35 = arith.subf %33, %34 : vector<8x1xf32>
      %cst_25 = arith.constant 0.000000e+00 : f32
      %36 = vector.broadcast %cst_25 : f32 to vector<8x1xf32>
      %37 = arith.maximumf %35, %36 : vector<8x1xf32>
      %cst_26 = arith.constant 9.99999974E-6 : f32
      %38 = vector.broadcast %cst_26 : f32 to vector<8x1xf32>
      %39 = arith.addf %37, %38 : vector<8x1xf32>
      %40 = math.rsqrt %39 : vector<8x1xf32>
      %c0_27 = arith.constant 0 : index
      %c0_28 = arith.constant 0 : index
      %41 = vector.load %arg4[%c0_27, %c0_28] : memref<8x1xf32, #tpu.memory_space<vmem>>, vector<8x1xf32>
      %42 = arith.mulf %40, %41 : vector<8x1xf32>
      %c0_29 = arith.constant 0 : index
      %c0_30 = arith.constant 0 : index
      %43 = vector.load %arg5[%c0_29, %c0_30] : memref<8x1xf32, #tpu.memory_space<vmem>>, vector<8x1xf32>
      %44 = arith.mulf %30, %42 : vector<8x1xf32>
      %45 = arith.subf %43, %44 : vector<8x1xf32>
      %c0_31 = arith.constant 0 : index
      %c0_32 = arith.constant 0 : index
      %c0_33 = arith.constant 0 : index
      %46 = vector.load %arg6[%c0_31, %c0_32, %c0_33] : memref<1x8x512xbf16, #tpu.memory_space<vmem>>, vector<1x8x512xbf16>
      %47 = vector.shape_cast %46 : vector<1x8x512xbf16> to vector<8x512xbf16>
      %48 = arith.extf %47 : vector<8x512xbf16> to vector<8x512xf32>
      %49 = vector.broadcast %42 : vector<8x1xf32> to vector<8x512xf32>
      %50 = arith.mulf %48, %49 : vector<8x512xf32>
      %51 = vector.broadcast %45 : vector<8x1xf32> to vector<8x512xf32>
      %52 = arith.addf %50, %51 : vector<8x512xf32>
      %cst_34 = arith.constant 0.000000e+00 : f32
      %53 = vector.broadcast %cst_34 : f32 to vector<8x512xf32>
      %54 = arith.maximumf %52, %53 : vector<8x512xf32>
      %55 = arith.truncf %54 : vector<8x512xf32> to vector<8x512xbf16>
      %c0_35 = arith.constant 0 : index
      %c0_36 = arith.constant 0 : index
      %c0_37 = arith.constant 0 : index
      %56 = vector.load %arg6[%c0_35, %c0_36, %c0_37] : memref<1x8x512xbf16, #tpu.memory_space<vmem>>, vector<1x8x512xbf16>
      %57 = vector.shape_cast %56 : vector<1x8x512xbf16> to vector<8x512xbf16>
      %58 = vector.shape_cast %55 : vector<8x512xbf16> to vector<1x8x512xbf16>
      tpu.vector_store %arg6[%c0_35, %c0_36, %c0_37], %58 {strides = array<i32>} : memref<1x8x512xbf16, #tpu.memory_space<vmem>>, vector<1x8x512xbf16>,
    } else {
    }
    return
  }
  func.func @transform_0(%arg0: i32, %arg1: i32) -> (i32, i32, i32) {
    %c0_i32 = arith.constant 0 : i32
    %c0_i32_0 = arith.constant 0 : i32
    return %arg0, %c0_i32, %arg1 : i32, i32, i32
  }
  func.func @transform_1(%arg0: i32, %arg1: i32) -> (i32, i32) {
    %c0_i32 = arith.constant 0 : i32
    %c0_i32_0 = arith.constant 0 : i32
    %c0_i32_1 = arith.constant 0 : i32
    return %c0_i32, %c0_i32_0 : i32, i32
  }
  func.func @transform_2(%arg0: i32, %arg1: i32) -> (i32, i32) {
    %c0_i32 = arith.constant 0 : i32
    %c0_i32_0 = arith.constant 0 : i32
    %c0_i32_1 = arith.constant 0 : i32
    return %c0_i32, %c0_i32_0 : i32, i32
  }
  func.func @transform_3(%arg0: i32, %arg1: i32) -> (i32, i32) {
    %c0_i32 = arith.constant 0 : i32
    %c0_i32_0 = arith.constant 0 : i32
    %c0_i32_1 = arith.constant 0 : i32
    return %c0_i32, %c0_i32_0 : i32, i32
  }
  func.func @transform_4(%arg0: i32, %arg1: i32) -> (i32, i32, i32) {
    %c0_i32 = arith.constant 0 : i32
    %c0_i32_0 = arith.constant 0 : i32
    %c0_i32_1 = arith.constant 0 : i32
    return %arg0, %c0_i32, %c0_i32_0 : i32, i32, i32
  }
}

module attributes {stable_mosaic.version = 11 : i64} {
  func.func @fused_conv_in_relu_kernel(%arg0: i32, %arg1: i32, %arg2: memref<1x224x512xbf16, #tpu.memory_space<vmem>>, %arg3: memref<8x224xbf16, #tpu.memory_space<vmem>>, %arg4: memref<8x1xf32, #tpu.memory_space<vmem>>, %arg5: memref<8x1xf32, #tpu.memory_space<vmem>>, %arg6: memref<1x8x512xf32, #tpu.memory_space<vmem>>, %arg7: memref<8x1xf32, #tpu.memory_space<vmem>>, %arg8: memref<8x1xf32, #tpu.memory_space<vmem>>) attributes {dimension_semantics = [#tpu.dimension_semantics<parallel>, #tpu.dimension_semantics<arbitrary>], iteration_bounds = array<i64: 2, 1>, scalar_prefetch = 0 : i64, scratch_operands = 2 : i64, tpu.core_type = #tpu.core_type<tc>, window_params = [{transform_indices = @transform_0, window_bounds = array<i64: 1, 224, 512>}, {pipeline_mode = #tpu.pipeline_mode<synchronous>, transform_indices = @transform_1, window_bounds = array<i64: 8, 224>}, {pipeline_mode = #tpu.pipeline_mode<synchronous>, transform_indices = @transform_2, window_bounds = array<i64: 8, 1>}, {pipeline_mode = #tpu.pipeline_mode<synchronous>, transform_indices = @transform_3, window_bounds = array<i64: 8, 1>}, {transform_indices = @transform_4, window_bounds = array<i64: 1, 8, 512>}]} {
    %c0_i32 = arith.constant 0 : i32
    %0 = arith.cmpi eq, %arg1, %c0_i32 : i32
    %1 = arith.extui %0 : i1 to i32
    %c0_i32_0 = arith.constant 0 : i32
    %2 = arith.cmpi ne, %1, %c0_i32_0 : i32
    scf.if %2 {
      %cst_19 = arith.constant 0.000000e+00 : f32
      %27 = vector.broadcast %cst_19 : f32 to vector<8x1xf32>
      %c0_20 = arith.constant 0 : index
      %c0_21 = arith.constant 0 : index
      %28 = vector.load %arg7[%c0_20, %c0_21] : memref<8x1xf32, #tpu.memory_space<vmem>>, vector<8x1xf32>
      tpu.vector_store %arg7[%c0_20, %c0_21], %27 {strides = array<i32>} : memref<8x1xf32, #tpu.memory_space<vmem>>, vector<8x1xf32>,
      %cst_22 = arith.constant 0.000000e+00 : f32
      %29 = vector.broadcast %cst_22 : f32 to vector<8x1xf32>
      %c0_23 = arith.constant 0 : index
      %c0_24 = arith.constant 0 : index
      %30 = vector.load %arg8[%c0_23, %c0_24] : memref<8x1xf32, #tpu.memory_space<vmem>>, vector<8x1xf32>
      tpu.vector_store %arg8[%c0_23, %c0_24], %29 {strides = array<i32>} : memref<8x1xf32, #tpu.memory_space<vmem>>, vector<8x1xf32>,
    } else {
    }
    %c0 = arith.constant 0 : index
    %c0_1 = arith.constant 0 : index
    %3 = vector.load %arg3[%c0, %c0_1] : memref<8x224xbf16, #tpu.memory_space<vmem>>, vector<8x224xbf16>
    %c0_2 = arith.constant 0 : index
    %c0_3 = arith.constant 0 : index
    %c0_4 = arith.constant 0 : index
    %4 = vector.load %arg2[%c0_2, %c0_3, %c0_4] : memref<1x224x512xbf16, #tpu.memory_space<vmem>>, vector<1x224x512xbf16>
    %5 = vector.shape_cast %4 : vector<1x224x512xbf16> to vector<224x512xbf16>
    %cst = arith.constant dense<0.000000e+00> : vector<8x512xf32>
    %6 = tpu.matmul %3, %5, %cst {dimension_numbers = #tpu.dot_dimension_numbers<[1], [0], [0], [1], [0, 0, 1, 1], [], []>} : vector<8x224xbf16>, vector<224x512xbf16>, vector<8x512xf32> -> vector<8x512xf32>
    %c512_i32 = arith.constant 512 : i32
    %7 = arith.muli %arg1, %c512_i32 : i32
    %8 = tpu.assume_multiple %7, 512 : i32
    %c0_5 = arith.constant 0 : index
    %c0_6 = arith.constant 0 : index
    %9 = arith.index_cast %8 : i32 to index
    %10 = vector.load %arg6[%c0_5, %c0_6, %9] : memref<1x8x512xf32, #tpu.memory_space<vmem>>, vector<1x8x512xf32>
    %11 = vector.shape_cast %10 : vector<1x8x512xf32> to vector<8x512xf32>
    %12 = vector.shape_cast %6 : vector<8x512xf32> to vector<1x8x512xf32>
    tpu.vector_store %arg6[%c0_5, %c0_6, %9], %12 {strides = array<i32>} : memref<1x8x512xf32, #tpu.memory_space<vmem>>, vector<1x8x512xf32>,
    %c0_7 = arith.constant 0 : index
    %c0_8 = arith.constant 0 : index
    %13 = vector.load %arg7[%c0_7, %c0_8] : memref<8x1xf32, #tpu.memory_space<vmem>>, vector<8x1xf32>
    %cst_9 = arith.constant dense<0.000000e+00> : vector<8xf32>
    %14 = vector.multi_reduction <add>, %6, %cst_9 [1] : vector<8x512xf32> to vector<8xf32>
    %15 = vector.shape_cast %14 : vector<8xf32> to vector<8x1xf32>
    %16 = arith.addf %13, %15 : vector<8x1xf32>
    %c0_10 = arith.constant 0 : index
    %c0_11 = arith.constant 0 : index
    %17 = vector.load %arg7[%c0_10, %c0_11] : memref<8x1xf32, #tpu.memory_space<vmem>>, vector<8x1xf32>
    tpu.vector_store %arg7[%c0_10, %c0_11], %16 {strides = array<i32>} : memref<8x1xf32, #tpu.memory_space<vmem>>, vector<8x1xf32>,
    %c0_12 = arith.constant 0 : index
    %c0_13 = arith.constant 0 : index
    %18 = vector.load %arg8[%c0_12, %c0_13] : memref<8x1xf32, #tpu.memory_space<vmem>>, vector<8x1xf32>
    %19 = arith.mulf %6, %6 : vector<8x512xf32>
    %cst_14 = arith.constant dense<0.000000e+00> : vector<8xf32>
    %20 = vector.multi_reduction <add>, %19, %cst_14 [1] : vector<8x512xf32> to vector<8xf32>
    %21 = vector.shape_cast %20 : vector<8xf32> to vector<8x1xf32>
    %22 = arith.addf %18, %21 : vector<8x1xf32>
    %c0_15 = arith.constant 0 : index
    %c0_16 = arith.constant 0 : index
    %23 = vector.load %arg8[%c0_15, %c0_16] : memref<8x1xf32, #tpu.memory_space<vmem>>, vector<8x1xf32>
    tpu.vector_store %arg8[%c0_15, %c0_16], %22 {strides = array<i32>} : memref<8x1xf32, #tpu.memory_space<vmem>>, vector<8x1xf32>,
    %c0_i32_17 = arith.constant 0 : i32
    %24 = arith.cmpi eq, %arg1, %c0_i32_17 : i32
    %25 = arith.extui %24 : i1 to i32
    %c0_i32_18 = arith.constant 0 : i32
    %26 = arith.cmpi ne, %25, %c0_i32_18 : i32
    scf.if %26 {
      %c0_19 = arith.constant 0 : index
      %c0_20 = arith.constant 0 : index
      %27 = vector.load %arg7[%c0_19, %c0_20] : memref<8x1xf32, #tpu.memory_space<vmem>>, vector<8x1xf32>
      %cst_21 = arith.constant 0.001953125 : f32
      %28 = vector.broadcast %cst_21 : f32 to vector<8x1xf32>
      %29 = arith.mulf %27, %28 : vector<8x1xf32>
      %c0_22 = arith.constant 0 : index
      %c0_23 = arith.constant 0 : index
      %30 = vector.load %arg8[%c0_22, %c0_23] : memref<8x1xf32, #tpu.memory_space<vmem>>, vector<8x1xf32>
      %cst_24 = arith.constant 0.001953125 : f32
      %31 = vector.broadcast %cst_24 : f32 to vector<8x1xf32>
      %32 = arith.mulf %30, %31 : vector<8x1xf32>
      %33 = arith.mulf %29, %29 : vector<8x1xf32>
      %34 = arith.subf %32, %33 : vector<8x1xf32>
      %cst_25 = arith.constant 0.000000e+00 : f32
      %35 = vector.broadcast %cst_25 : f32 to vector<8x1xf32>
      %36 = arith.maximumf %34, %35 : vector<8x1xf32>
      %cst_26 = arith.constant 9.99999974E-6 : f32
      %37 = vector.broadcast %cst_26 : f32 to vector<8x1xf32>
      %38 = arith.addf %36, %37 : vector<8x1xf32>
      %39 = math.rsqrt %38 : vector<8x1xf32>
      %c0_27 = arith.constant 0 : index
      %c0_28 = arith.constant 0 : index
      %40 = vector.load %arg4[%c0_27, %c0_28] : memref<8x1xf32, #tpu.memory_space<vmem>>, vector<8x1xf32>
      %41 = arith.mulf %39, %40 : vector<8x1xf32>
      %c0_29 = arith.constant 0 : index
      %c0_30 = arith.constant 0 : index
      %42 = vector.load %arg5[%c0_29, %c0_30] : memref<8x1xf32, #tpu.memory_space<vmem>>, vector<8x1xf32>
      %43 = arith.mulf %29, %41 : vector<8x1xf32>
      %44 = arith.subf %42, %43 : vector<8x1xf32>
      %c0_31 = arith.constant 0 : index
      %c0_32 = arith.constant 0 : index
      %c0_33 = arith.constant 0 : index
      %45 = vector.load %arg6[%c0_31, %c0_32, %c0_33] : memref<1x8x512xf32, #tpu.memory_space<vmem>>, vector<1x8x512xf32>
      %46 = vector.shape_cast %45 : vector<1x8x512xf32> to vector<8x512xf32>
      %47 = vector.broadcast %41 : vector<8x1xf32> to vector<8x512xf32>
      %48 = arith.mulf %46, %47 : vector<8x512xf32>
      %49 = vector.broadcast %44 : vector<8x1xf32> to vector<8x512xf32>
      %50 = arith.addf %48, %49 : vector<8x512xf32>
      %cst_34 = arith.constant 0.000000e+00 : f32
      %51 = vector.broadcast %cst_34 : f32 to vector<8x512xf32>
      %52 = arith.maximumf %50, %51 : vector<8x512xf32>
      %c0_35 = arith.constant 0 : index
      %c0_36 = arith.constant 0 : index
      %c0_37 = arith.constant 0 : index
      %53 = vector.load %arg6[%c0_35, %c0_36, %c0_37] : memref<1x8x512xf32, #tpu.memory_space<vmem>>, vector<1x8x512xf32>
      %54 = vector.shape_cast %53 : vector<1x8x512xf32> to vector<8x512xf32>
      %55 = vector.shape_cast %52 : vector<8x512xf32> to vector<1x8x512xf32>
      tpu.vector_store %arg6[%c0_35, %c0_36, %c0_37], %55 {strides = array<i32>} : memref<1x8x512xf32, #tpu.memory_space<vmem>>, vector<1x8x512xf32>,
    } else {
    }
    return
  }
  func.func @transform_0(%arg0: i32, %arg1: i32) -> (i32, i32, i32) {
    %c0_i32 = arith.constant 0 : i32
    %c0_i32_0 = arith.constant 0 : i32
    return %arg0, %c0_i32, %arg1 : i32, i32, i32
  }
  func.func @transform_1(%arg0: i32, %arg1: i32) -> (i32, i32) {
    %c0_i32 = arith.constant 0 : i32
    %c0_i32_0 = arith.constant 0 : i32
    %c0_i32_1 = arith.constant 0 : i32
    return %c0_i32, %c0_i32_0 : i32, i32
  }
  func.func @transform_2(%arg0: i32, %arg1: i32) -> (i32, i32) {
    %c0_i32 = arith.constant 0 : i32
    %c0_i32_0 = arith.constant 0 : i32
    %c0_i32_1 = arith.constant 0 : i32
    return %c0_i32, %c0_i32_0 : i32, i32
  }
  func.func @transform_3(%arg0: i32, %arg1: i32) -> (i32, i32) {
    %c0_i32 = arith.constant 0 : i32
    %c0_i32_0 = arith.constant 0 : i32
    %c0_i32_1 = arith.constant 0 : i32
    return %c0_i32, %c0_i32_0 : i32, i32
  }
  func.func @transform_4(%arg0: i32, %arg1: i32) -> (i32, i32, i32) {
    %c0_i32 = arith.constant 0 : i32
    %c0_i32_0 = arith.constant 0 : i32
    %c0_i32_1 = arith.constant 0 : i32
    return %arg0, %c0_i32, %c0_i32_0 : i32, i32, i32
  }
}

</mosaic_0001>

<bundles_post_ra>
// kernel: downsample_block.2
= control target key start
LH: loop header
LB: loop body
LE: loop exit
PB: predicated region body
PF: predicated region fallthrough
CT: control target
= control target key end

     0   :  { %s840_s15 = smov 0   ;;  %s842_s16 = smov 0   ;;  %s920_s0 = inlined_call_operand.vmem [shape: bf16[2,112,512], index: 0, kind: input, shape index: {}]   ;;  %s921_s1 = inlined_call_operand.vmem [shape: bf16[8,112], index: 1, kind: input, shape index: {}]   ;;  %s922_s2 = inlined_call_operand.vmem [shape: f32[8,1], index: 2, kind: input, shape index: {}]   ;;  %s923_s3 = inlined_call_operand.vmem [shape: f32[8,1], index: 3, kind: input, shape index: {}]   ;;  %s924_s4 = inlined_call_operand.vmem [shape: bf16[2,8,512], index: 4, kind: output, shape index: {}]  }
   0x1   :  { %s844_s17 = smov 0  }
   0x2 LB: > { %s26_s18 = sadd.s32 1, %s807_s16  ;;  %p671_p0 = scmp.ge.s32.totalorder %s811_s17, 1  ;;  %s811_s17 = sphi %s844_s17, %s14_s17   ;;  %s807_s16 = sphi %s842_s16, %s926_s16   ;;  %s803_s15 = sphi %s840_s15, %s925_s15  }
   0x3   : > { %p28_p1 = scmp.ge.s32.totalorder %s26_s18, 2  ;;  %p181_p2 = scmp.lt.s32.totalorder %s811_s17, 3 }
   0x5   : > { %s928_s18 = smov (%p28_p1, %s26_s18), 0  ;;  %p182_p3 = pnand %p671_p0, %p181_p2 }
   0x6   : > { %p212_p4 = scmp.lt.s32.totalorder (!%p182_p3), %s803_s15, 1  ;;  %v813_v0 = vmov (!%p182_p3), 0   ;;  %v234_v29 = vld [vmem:[%s921_s1] sm:$0xf] (!%p182_p3)  ;;  %vm403_vm0 = vcmask (!%p182_p3), 916480   ;;  %vm231_vm1 = vcmask (!%p182_p3), 7168  }
   0x7   : > { %185 = sbr.rel (%p182_p3) target bundleno = 582 (0x246), region = 36  ;;  %439 = vmatprep.mubr.bf16.mxu0 (!%p182_p3), %v813_v0  ;;  %480 = vmatprep.mubr.bf16.mxu1 (!%p182_p3), %v813_v0  ;;  %v814_v30 = vmov (!%p182_p3), 0.0  }
   0x8   : > { %743 = vset.pattern.permute.xlu1 (!%p182_p3), %v813_v0  ;;  %744 = vset.pattern.permute.xlu0 (!%p182_p3), %v813_v0  ;;  %232 = vst.msk [vmem:[#allocation2] sm:$0xff] (!%p182_p3), %vm231_vm1, %v814_v30  ;;  %233 = vst.msk [vmem:[#allocation3] sm:$0xff] (!%p182_p3), %vm231_vm1, %v814_v30 }
   0xe   : > { %s930_s15 = smov (!%p212_p4, %s803_s15), 1 }
   0xf   : > { %s716_s19 = smul.u32 224, %s930_s15  ;;  %v512_v51 = vld [vmem:[#allocation2] sm:$0xff]  ;;  %v521_v54 = vld [vmem:[#allocation3] sm:$0xff]  ;;  %s711_s29 = sshll.u32 %s930_s15, 4 }
  0x10   : > { %s225_s6 = scalar_lea.vmem %s924_s4, %s711_s29 }
  0x11   : > { %s864_s22 = scalar_lea.vmem %s920_s0, %s716_s19 }
  0x12   : > { %v745_v1 = vld [vmem:[%s864_s22 + $0x4] ss:$16 sps:$4 sm:$0xff]   ;;  %v747_v2 = vld [vmem:[%s864_s22 + $0xc] ss:$16 sps:$4 sm:$0xff]   ;;  %v749_v3 = vld [vmem:[%s864_s22] ss:$16 sps:$4 sm:$0xff]  }
  0x13   : > { %407 = vmatprep.subr.bf16.mxu0 %v745_v1  ;;  %v750_v4 = vld [vmem:[%s864_s22 + $0x8] ss:$16 sps:$4 sm:$0xff]   ;;  %448 = vmatprep.subr.bf16.mxu1 %v747_v2  ;;  %v751_v5 = vld [vmem:[%s864_s22 + $0x24] ss:$16 sps:$4 sm:$0xff]   ;;  %v753_v6 = vld [vmem:[%s864_s22 + $0x2c] ss:$16 sps:$4 sm:$0xff]  }
  0x14   : > { %408 = vmatpush1.bf16.msra.mxu0 %v749_v3  ;;  %449 = vmatpush1.bf16.msra.mxu1 %v750_v4  ;;  %v755_v7 = vld [vmem:[%s864_s22 + $0x20] ss:$16 sps:$4 sm:$0xff]   ;;  %v756_v8 = vld [vmem:[%s864_s22 + $0x28] ss:$16 sps:$4 sm:$0xff]   ;;  %v757_v9 = vld [vmem:[%s864_s22 + $0x44] ss:$16 sps:$4 sm:$0xff]  }
  0x15   : > { %409 = vmatprep.subr.bf16.mxu0 %v751_v5  ;;  %450 = vmatprep.subr.bf16.mxu1 %v753_v6  ;;  %v759_v10 = vld [vmem:[%s864_s22 + $0x4c] ss:$16 sps:$4 sm:$0xff]   ;;  %v761_v11 = vld [vmem:[%s864_s22 + $0x40] ss:$16 sps:$4 sm:$0xff]   ;;  %v762_v12 = vld [vmem:[%s864_s22 + $0x48] ss:$16 sps:$4 sm:$0xff]  }
  0x16   : > { %v763_v13 = vld [vmem:[%s864_s22 + $0x64] ss:$16 sps:$4 sm:$0xff]   ;;  %v765_v14 = vld [vmem:[%s864_s22 + $0x6c] ss:$16 sps:$4 sm:$0xff]   ;;  %v767_v15 = vld [vmem:[%s864_s22 + $0x60] ss:$16 sps:$4 sm:$0xff]  }
  0x17   : > { %v768_v16 = vld [vmem:[%s864_s22 + $0x68] ss:$16 sps:$4 sm:$0xff]   ;;  %v769_v17 = vld [vmem:[%s864_s22 + $0x84] ss:$16 sps:$4 sm:$0xff]   ;;  %v771_v18 = vld [vmem:[%s864_s22 + $0x8c] ss:$16 sps:$4 sm:$0xff]  }
  0x18   : > { %410 = vmatpush1.bf16.msra.mxu0 %v755_v7  ;;  %451 = vmatpush1.bf16.msra.mxu1 %v756_v8  ;;  %v773_v19 = vld [vmem:[%s864_s22 + $0x80] ss:$16 sps:$4 sm:$0xff]   ;;  %v774_v20 = vld [vmem:[%s864_s22 + $0x88] ss:$16 sps:$4 sm:$0xff]   ;;  %v775_v21 = vld [vmem:[%s864_s22 + $0xa4] ss:$16 sps:$4 sm:$0xff]  }
  0x19   : > { %411 = vmatprep.subr.bf16.mxu0 %v757_v9  ;;  %452 = vmatprep.subr.bf16.mxu1 %v759_v10  ;;  %v777_v22 = vld [vmem:[%s864_s22 + $0xac] ss:$16 sps:$4 sm:$0xff]   ;;  %v779_v23 = vld [vmem:[%s864_s22 + $0xa0] ss:$16 sps:$4 sm:$0xff]   ;;  %v780_v24 = vld [vmem:[%s864_s22 + $0xa8] ss:$16 sps:$4 sm:$0xff]  }
  0x1a   : > { %v781_v25 = vld [vmem:[%s864_s22 + $0xc4] ss:$16 sps:$4 sm:$0xff]   ;;  %v783_v26 = vld [vmem:[%s864_s22 + $0xcc] ss:$16 sps:$4 sm:$0xff]   ;;  %v785_v27 = vld [vmem:[%s864_s22 + $0xc0] ss:$16 sps:$4 sm:$0xff]  }
  0x1b   : > { %v786_v28 = vld [vmem:[%s864_s22 + $0xc8] ss:$16 sps:$4 sm:$0xff]   ;;  %v545_v1 = vld [vmem:[%s922_s2] sm:$0xff] }
  0x1c   : > { %412 = vmatpush1.bf16.msra.mxu0 %v761_v11  ;;  %453 = vmatpush1.bf16.msra.mxu1 %v762_v12  ;;  %v547_v4 = vld [vmem:[%s923_s3] sm:$0xff] }
  0x1d   : > { %413 = vmatprep.subr.bf16.mxu0 %v763_v13  ;;  %454 = vmatprep.subr.bf16.mxu1 %v765_v14 }
  0x20   : > { %414 = vmatpush1.bf16.msra.mxu0 %v767_v15  ;;  %455 = vmatpush1.bf16.msra.mxu1 %v768_v16 }
  0x21   : > { %415 = vmatprep.subr.bf16.mxu0 %v769_v17  ;;  %456 = vmatprep.subr.bf16.mxu1 %v771_v18 }
  0x24   : > { %416 = vmatpush1.bf16.msra.mxu0 %v773_v19  ;;  %457 = vmatpush1.bf16.msra.mxu1 %v774_v20 }
  0x25   : > { %417 = vmatprep.subr.bf16.mxu0 %v775_v21  ;;  %458 = vmatprep.subr.bf16.mxu1 %v777_v22 }
  0x28   : > { %418 = vmatpush1.bf16.msra.mxu0 %v779_v23  ;;  %459 = vmatpush1.bf16.msra.mxu1 %v780_v24 }
  0x29   : > { %419 = vmatprep.subr.bf16.mxu0 %v781_v25  ;;  %460 = vmatprep.subr.bf16.mxu1 %v783_v26 }
  0x2c   : > { %420 = vmatpush1.bf16.msra.mxu0 %v785_v27  ;;  %461 = vmatpush1.bf16.msra.mxu1 %v786_v28 }
  0x2f   : > { %703 = vmatmul.mubr.msk.bf16.vlgmr.msra.gmra.mrb[0].mxu0 %vm403_vm0, %v234_v29  ;;  %704 = vmatmul.mubr.msk.bf16.vlgmr.msra.gmra.mrb[0].mxu1 %vm403_vm0, %v234_v29 }
 0x102   : > { %v441_v31 = vpop.f32.mrb[0].mxu0  ;;  %v482_v32 = vpop.f32.mrb[0].mxu1 }
 0x103   : > { %v522_v33 = vmul.f32 %v441_v31, %v441_v31  ;;  %v524_v34 = vmul.f32 %v482_v32, %v482_v32  ;;  %v443_v35 = vpop.f32.mrb[1].mxu0  ;;  %v484_v36 = vpop.f32.mrb[1].mxu1 }
 0x104   : > { %v712_v37 = vpack.c.bf16 %v443_v35, %v441_v31  ;;  %v513_v38 = vadd.f32 %v443_v35, %v441_v31  ;;  %v523_v39 = vmul.f32 %v443_v35, %v443_v35  ;;  %v713_v40 = vpack.c.bf16 %v484_v36, %v482_v32  ;;  %v445_v41 = vpop.f32.mrb[2].mxu0  ;;  %v486_v42 = vpop.f32.mrb[2].mxu1 }
 0x105   : > { %v446_v43 = vpop.f32.mrb[3].mxu0  ;;  %v487_v44 = vpop.f32.mrb[3].mxu1  ;;  %v525_v48 = vmul.f32 %v484_v36, %v484_v36 }
 0x106   : > { %v514_v45 = vadd.f32 %v513_v38, %v482_v32  ;;  %v526_v46 = vadd.f32 %v523_v39, %v522_v33  ;;  %v554_v8 = vunpack.c.l.bf16 %v713_v40  ;;  %v555_v9 = vunpack.c.h.bf16 %v713_v40 }
 0x107   : > { %v552_v10 = vunpack.c.l.bf16 %v712_v37  ;;  %v553_v11 = vunpack.c.h.bf16 %v712_v37 }
 0x108   : > { %v515_v47 = vadd.f32 %v514_v45, %v484_v36  ;;  %v527_v49 = vadd.f32 %v526_v46, %v524_v34 }
 0x10a   : > { %516 = vadd.xlane.f32.xlu0 %v515_v47  ;;  %v528_v50 = vadd.f32 %v527_v49, %v525_v48 }
 0x10e   : > { %529 = vadd.xlane.f32.xlu0 %v528_v50 }
 0x197   : > { %v517_v52 = vpop.xlane.xlu0 %516 }
 0x198   : > { %v518_v53 = vadd.f32 %v517_v52, %v512_v51 }
 0x19a   : > { %520 = vst.msk [vmem:[#allocation2] sm:$0xff] %vm231_vm1, %v518_v53 }
 0x19b   : > { %v530_v55 = vpop.xlane.xlu0 %529 }
 0x19c   : > { %v531_v56 = vadd.f32 %v530_v55, %v521_v54 }
 0x19e   : > { %532 = vst.msk [vmem:[#allocation3] sm:$0xff] %vm231_vm1, %v531_v56 }
 0x1a1   : > { %v536_v57 = vld [vmem:[#allocation2] sm:$0xff] }
 0x1a2   : > { %v537_v58 = vmul.f32 0.001953125, %v536_v57 }
 0x1a4   : > { %v540_v61 = vmul.f32 %v537_v58, %v537_v58 }
 0x1a5   : > { %v538_v59 = vld [vmem:[#allocation3] sm:$0xff] }
 0x1a6   : > { %v539_v60 = vmul.f32 0.001953125, %v538_v59 }
 0x1a8   : > { %v541_v62 = vsub.f32 %v539_v60, %v540_v61 }
 0x1aa   : > { %v542_v63 = vmax.f32 %v541_v62, 0.0 }
 0x1ac   : > { %v543_v0 = vadd.f32 1e-05, %v542_v63 }
 0x1ae   : > { %787 = vrsqrt.f32 %v543_v0 }
 0x1b8   : > { %v788_v2 = vpop.eup %787 }
 0x1b9   : > { %v546_v3 = vmul.f32 %v788_v2, %v545_v1 }
 0x1bb   : > { %558 = vperm.xlu1 %743, %v546_v3   ;;  %v548_v5 = vmul.f32 %v546_v3, %v537_v58 }
 0x1bd   : > { %v549_v6 = vsub.f32 %v547_v4, %v548_v5 }
 0x1bf   : > { %567 = vperm.xlu1 %743, %v549_v6  }
 0x23a   : > { %v559_v7 = vpop.permute.xlu1 %558 }
 0x23b   : > { %v563_v12 = vmul.f32 %v559_v7, %v554_v8  ;;  %v564_v13 = vmul.f32 %v559_v7, %v555_v9  ;;  %v561_v14 = vmul.f32 %v559_v7, %v552_v10  ;;  %v562_v15 = vmul.f32 %v559_v7, %v553_v11 }
 0x23e   : > { %v568_v16 = vpop.permute.xlu1 %567 }
 0x23f   : > { %v570_v17 = vadd.f32 %v568_v16, %v561_v14  ;;  %v571_v18 = vadd.f32 %v568_v16, %v562_v15  ;;  %v572_v19 = vadd.f32 %v568_v16, %v563_v12  ;;  %v573_v20 = vadd.f32 %v568_v16, %v564_v13 }
 0x241   : > { %v574_v21 = vmax.f32 %v570_v17, 0.0  ;;  %v575_v22 = vmax.f32 %v571_v18, 0.0  ;;  %v576_v23 = vmax.f32 %v572_v19, 0.0  ;;  %v577_v24 = vmax.f32 %v573_v20, 0.0 }
 0x243   : > { %v714_v25 = vpack.c.bf16 %v575_v22, %v574_v21  ;;  %v715_v26 = vpack.c.bf16 %v577_v24, %v576_v23 }
 0x245   : > { %594 = vst [vmem:[%s225_s6] sm:$0xff] %v714_v25  ;;  %595 = vst [vmem:[%s225_s6 + $0x8] sm:$0xff] %v715_v26 }
 0x246 PF: > { %s14_s17 = sadd.s32 1, %s811_s17   ;;  %s925_s15 = smov %s807_s16 }
 0x247   : > { %p11_p5 = scmp.ge.s32.totalorder %s14_s17, 4   ;;  %s926_s16 = smov %s928_s18 }
 0x249   :  { %13 = sbr.rel (!%p11_p5) target bundleno = 2 (0x2), region = 75 }

// kernel: downsample_block.3
= control target key start
LH: loop header
LB: loop body
LE: loop exit
PB: predicated region body
PF: predicated region fallthrough
CT: control target
= control target key end

     0   :  { %s1050_s15 = smov 0   ;;  %s1052_s16 = smov 0   ;;  %s1164_s0 = inlined_call_operand.vmem [shape: bf16[2,224,512], index: 0, kind: input, shape index: {}]   ;;  %s1165_s1 = inlined_call_operand.vmem [shape: bf16[8,224], index: 1, kind: input, shape index: {}]   ;;  %s1166_s2 = inlined_call_operand.vmem [shape: f32[8,1], index: 2, kind: input, shape index: {}]   ;;  %s1167_s3 = inlined_call_operand.vmem [shape: f32[8,1], index: 3, kind: input, shape index: {}]   ;;  %s1168_s4 = inlined_call_operand.vmem [shape: f32[2,8,512], index: 4, kind: output, shape index: {}]  }
   0x1   :  { %s1054_s17 = smov 0  }
   0x2 LB: > { %s26_s18 = sadd.s32 1, %s1017_s16  ;;  %p815_p0 = scmp.ge.s32.totalorder %s1021_s17, 1  ;;  %s1021_s17 = sphi %s1054_s17, %s14_s17   ;;  %s1017_s16 = sphi %s1052_s16, %s1170_s16   ;;  %s1013_s15 = sphi %s1050_s15, %s1169_s15  }
   0x3   : > { %p28_p1 = scmp.ge.s32.totalorder %s26_s18, 2  ;;  %p181_p2 = scmp.lt.s32.totalorder %s1021_s17, 3 }
   0x5   : > { %s1172_s18 = smov (%p28_p1, %s26_s18), 0  ;;  %p182_p3 = pnand %p815_p0, %p181_p2 }
   0x6   : > { %p212_p4 = scmp.lt.s32.totalorder (!%p182_p3), %s1013_s15, 1  ;;  %v1071_v0 = vld [vmem:[%s1165_s1] sm:$0xff] (!%p182_p3)  ;;  %vm577_vm0 = vcmask (!%p182_p3), 785408   ;;  %vm231_vm1 = vcmask (!%p182_p3), 7168   ;;  %v1023_v59 = vmov (!%p182_p3), 0.0  }
   0x7   : > { %185 = sbr.rel (%p182_p3) target bundleno = 609 (0x261), region = 36  ;;  %v820_v1 = vcombine.high (!%p182_p3), %v1071_v0, %v1071_v0  ;;  %v819_v58 = vcombine.low (!%p182_p3), %v1071_v0, %v1071_v0  ;;  %232 = vst.msk [vmem:[#allocation2] sm:$0xff] (!%p182_p3), %vm231_vm1, %v1023_v59  ;;  %233 = vst.msk [vmem:[#allocation3] sm:$0xff] (!%p182_p3), %vm231_vm1, %v1023_v59 }
   0x9   : > { %877 = vmatprep.mubr.msk.bf16.mxu0 (!%p182_p3), %vm577_vm0, %v820_v1  ;;  %878 = vmatprep.mubr.msk.bf16.mxu1 (!%p182_p3), %vm577_vm0, %v820_v1 }
   0xe   : > { %s1174_s15 = smov (!%p212_p4, %s1013_s15), 1 }
   0xf   : > { %s882_s21 = smul.u32 448, %s1174_s15  ;;  %s881_s29 = sshll.u32 %s1174_s15, 5 }
  0x10   : > { %s225_s6 = scalar_lea.vmem %s1168_s4, %s881_s29 }
  0x11   : > { %s1081_s24 = scalar_lea.vmem %s1164_s0, %s882_s21 }
  0x12   : > { %v911_v2 = vld [vmem:[%s1081_s24 + $0x4] ss:$16 sps:$4 sm:$0xff]   ;;  %v913_v3 = vld [vmem:[%s1081_s24 + $0xc] ss:$16 sps:$4 sm:$0xff]   ;;  %v915_v4 = vld [vmem:[%s1081_s24] ss:$16 sps:$4 sm:$0xff]  }
  0x13   : > { %581 = vmatprep.subr.bf16.mxu0 %v911_v2  ;;  %v916_v5 = vld [vmem:[%s1081_s24 + $0x8] ss:$16 sps:$4 sm:$0xff]   ;;  %622 = vmatprep.subr.bf16.mxu1 %v913_v3  ;;  %v917_v6 = vld [vmem:[%s1081_s24 + $0x24] ss:$16 sps:$4 sm:$0xff]   ;;  %v919_v7 = vld [vmem:[%s1081_s24 + $0x2c] ss:$16 sps:$4 sm:$0xff]  }
  0x14   : > { %582 = vmatpush1.bf16.msra.mxu0 %v915_v4  ;;  %623 = vmatpush1.bf16.msra.mxu1 %v916_v5  ;;  %v921_v8 = vld [vmem:[%s1081_s24 + $0x20] ss:$16 sps:$4 sm:$0xff]   ;;  %v922_v9 = vld [vmem:[%s1081_s24 + $0x28] ss:$16 sps:$4 sm:$0xff]   ;;  %v923_v10 = vld [vmem:[%s1081_s24 + $0x44] ss:$16 sps:$4 sm:$0xff]  }
  0x15   : > { %583 = vmatprep.subr.bf16.mxu0 %v917_v6  ;;  %624 = vmatprep.subr.bf16.mxu1 %v919_v7  ;;  %v925_v11 = vld [vmem:[%s1081_s24 + $0x4c] ss:$16 sps:$4 sm:$0xff]   ;;  %v927_v12 = vld [vmem:[%s1081_s24 + $0x40] ss:$16 sps:$4 sm:$0xff]   ;;  %v928_v13 = vld [vmem:[%s1081_s24 + $0x48] ss:$16 sps:$4 sm:$0xff]  }
  0x16   : > { %v929_v14 = vld [vmem:[%s1081_s24 + $0x64] ss:$16 sps:$4 sm:$0xff]   ;;  %v931_v15 = vld [vmem:[%s1081_s24 + $0x6c] ss:$16 sps:$4 sm:$0xff]   ;;  %v933_v16 = vld [vmem:[%s1081_s24 + $0x60] ss:$16 sps:$4 sm:$0xff]  }
  0x17   : > { %v934_v17 = vld [vmem:[%s1081_s24 + $0x68] ss:$16 sps:$4 sm:$0xff]   ;;  %v935_v18 = vld [vmem:[%s1081_s24 + $0x84] ss:$16 sps:$4 sm:$0xff]   ;;  %v937_v19 = vld [vmem:[%s1081_s24 + $0x8c] ss:$16 sps:$4 sm:$0xff]  }
  0x18   : > { %584 = vmatpush1.bf16.msra.mxu0 %v921_v8  ;;  %625 = vmatpush1.bf16.msra.mxu1 %v922_v9  ;;  %v939_v20 = vld [vmem:[%s1081_s24 + $0x80] ss:$16 sps:$4 sm:$0xff]   ;;  %v940_v21 = vld [vmem:[%s1081_s24 + $0x88] ss:$16 sps:$4 sm:$0xff]   ;;  %v941_v22 = vld [vmem:[%s1081_s24 + $0xa4] ss:$16 sps:$4 sm:$0xff]  }
  0x19   : > { %585 = vmatprep.subr.bf16.mxu0 %v923_v10  ;;  %626 = vmatprep.subr.bf16.mxu1 %v925_v11  ;;  %v943_v23 = vld [vmem:[%s1081_s24 + $0xac] ss:$16 sps:$4 sm:$0xff]   ;;  %v945_v24 = vld [vmem:[%s1081_s24 + $0xa0] ss:$16 sps:$4 sm:$0xff]   ;;  %v946_v25 = vld [vmem:[%s1081_s24 + $0xa8] ss:$16 sps:$4 sm:$0xff]  }
  0x1a   : > { %v947_v26 = vld [vmem:[%s1081_s24 + $0xc4] ss:$16 sps:$4 sm:$0xff]   ;;  %v949_v27 = vld [vmem:[%s1081_s24 + $0xcc] ss:$16 sps:$4 sm:$0xff]   ;;  %v951_v28 = vld [vmem:[%s1081_s24 + $0xc0] ss:$16 sps:$4 sm:$0xff]  }
  0x1b   : > { %v952_v29 = vld [vmem:[%s1081_s24 + $0xc8] ss:$16 sps:$4 sm:$0xff]   ;;  %v953_v30 = vld [vmem:[%s1081_s24 + $0xe4] ss:$16 sps:$4 sm:$0xff]   ;;  %v955_v31 = vld [vmem:[%s1081_s24 + $0xec] ss:$16 sps:$4 sm:$0xff]  }
  0x1c   : > { %586 = vmatpush1.bf16.msra.mxu0 %v927_v12  ;;  %627 = vmatpush1.bf16.msra.mxu1 %v928_v13  ;;  %v957_v32 = vld [vmem:[%s1081_s24 + $0xe0] ss:$16 sps:$4 sm:$0xff]   ;;  %v958_v33 = vld [vmem:[%s1081_s24 + $0xe8] ss:$16 sps:$4 sm:$0xff]   ;;  %v959_v34 = vld [vmem:[%s1081_s24 + $0x104] ss:$16 sps:$4 sm:$0xff]  }
  0x1d   : > { %587 = vmatprep.subr.bf16.mxu0 %v929_v14  ;;  %628 = vmatprep.subr.bf16.mxu1 %v931_v15  ;;  %v961_v35 = vld [vmem:[%s1081_s24 + $0x10c] ss:$16 sps:$4 sm:$0xff]   ;;  %v963_v36 = vld [vmem:[%s1081_s24 + $0x100] ss:$16 sps:$4 sm:$0xff]   ;;  %v964_v37 = vld [vmem:[%s1081_s24 + $0x108] ss:$16 sps:$4 sm:$0xff]  }
  0x1e   : > { %v965_v38 = vld [vmem:[%s1081_s24 + $0x124] ss:$16 sps:$4 sm:$0xff]   ;;  %v967_v39 = vld [vmem:[%s1081_s24 + $0x12c] ss:$16 sps:$4 sm:$0xff]   ;;  %v969_v40 = vld [vmem:[%s1081_s24 + $0x120] ss:$16 sps:$4 sm:$0xff]  }
  0x1f   : > { %v970_v41 = vld [vmem:[%s1081_s24 + $0x128] ss:$16 sps:$4 sm:$0xff]   ;;  %v971_v42 = vld [vmem:[%s1081_s24 + $0x144] ss:$16 sps:$4 sm:$0xff]   ;;  %v973_v43 = vld [vmem:[%s1081_s24 + $0x14c] ss:$16 sps:$4 sm:$0xff]  }
  0x20   : > { %588 = vmatpush1.bf16.msra.mxu0 %v933_v16  ;;  %629 = vmatpush1.bf16.msra.mxu1 %v934_v17  ;;  %v975_v44 = vld [vmem:[%s1081_s24 + $0x140] ss:$16 sps:$4 sm:$0xff]   ;;  %v976_v45 = vld [vmem:[%s1081_s24 + $0x148] ss:$16 sps:$4 sm:$0xff]   ;;  %v977_v46 = vld [vmem:[%s1081_s24 + $0x164] ss:$16 sps:$4 sm:$0xff]  }
  0x21   : > { %589 = vmatprep.subr.bf16.mxu0 %v935_v18  ;;  %630 = vmatprep.subr.bf16.mxu1 %v937_v19  ;;  %v979_v47 = vld [vmem:[%s1081_s24 + $0x16c] ss:$16 sps:$4 sm:$0xff]   ;;  %v981_v48 = vld [vmem:[%s1081_s24 + $0x160] ss:$16 sps:$4 sm:$0xff]   ;;  %v982_v49 = vld [vmem:[%s1081_s24 + $0x168] ss:$16 sps:$4 sm:$0xff]  }
  0x22   : > { %v983_v50 = vld [vmem:[%s1081_s24 + $0x184] ss:$16 sps:$4 sm:$0xff]   ;;  %v985_v51 = vld [vmem:[%s1081_s24 + $0x18c] ss:$16 sps:$4 sm:$0xff]   ;;  %v987_v52 = vld [vmem:[%s1081_s24 + $0x180] ss:$16 sps:$4 sm:$0xff]  }
  0x23   : > { %v988_v53 = vld [vmem:[%s1081_s24 + $0x188] ss:$16 sps:$4 sm:$0xff]   ;;  %v989_v54 = vld [vmem:[%s1081_s24 + $0x1a4] ss:$16 sps:$4 sm:$0xff]   ;;  %v991_v55 = vld [vmem:[%s1081_s24 + $0x1ac] ss:$16 sps:$4 sm:$0xff]  }
  0x24   : > { %590 = vmatpush1.bf16.msra.mxu0 %v939_v20  ;;  %631 = vmatpush1.bf16.msra.mxu1 %v940_v21  ;;  %v993_v56 = vld [vmem:[%s1081_s24 + $0x1a0] ss:$16 sps:$4 sm:$0xff]   ;;  %v994_v57 = vld [vmem:[%s1081_s24 + $0x1a8] ss:$16 sps:$4 sm:$0xff]   ;;  %v1024_v14 = vmov 0  }
  0x25   : > { %591 = vmatprep.subr.bf16.mxu0 %v941_v22  ;;  %632 = vmatprep.subr.bf16.mxu1 %v943_v23  ;;  %v672_v15 = vld [vmem:[#allocation2] sm:$0xff]  ;;  %v681_v18 = vld [vmem:[#allocation3] sm:$0xff] }
  0x26   : > { %909 = vset.pattern.permute.xlu1 %v1024_v14  ;;  %910 = vset.pattern.permute.xlu0 %v1024_v14 }
  0x28   : > { %592 = vmatpush1.bf16.msra.mxu0 %v945_v24  ;;  %633 = vmatpush1.bf16.msra.mxu1 %v946_v25 }
  0x29   : > { %593 = vmatprep.subr.bf16.mxu0 %v947_v26  ;;  %634 = vmatprep.subr.bf16.mxu1 %v949_v27 }
  0x2c   : > { %594 = vmatpush1.bf16.msra.mxu0 %v951_v28  ;;  %635 = vmatpush1.bf16.msra.mxu1 %v952_v29  ;;  %v705_v29 = vld [vmem:[%s1166_s2] sm:$0xff] }
  0x2d   : > { %595 = vmatprep.subr.bf16.mxu0 %v953_v30  ;;  %636 = vmatprep.subr.bf16.mxu1 %v955_v31 }
  0x30   : > { %596 = vmatpush1.bf16.msra.mxu0 %v957_v32  ;;  %637 = vmatpush1.bf16.msra.mxu1 %v958_v33  ;;  %v707_v32 = vld [vmem:[%s1167_s3] sm:$0xff] }
  0x31   : > { %597 = vmatprep.subr.bf16.mxu0 %v959_v34  ;;  %638 = vmatprep.subr.bf16.mxu1 %v961_v35 }
  0x34   : > { %598 = vmatpush1.bf16.msra.mxu0 %v963_v36  ;;  %639 = vmatpush1.bf16.msra.mxu1 %v964_v37 }
  0x35   : > { %599 = vmatprep.subr.bf16.mxu0 %v965_v38  ;;  %640 = vmatprep.subr.bf16.mxu1 %v967_v39 }
  0x38   : > { %600 = vmatpush1.bf16.msra.mxu0 %v969_v40  ;;  %641 = vmatpush1.bf16.msra.mxu1 %v970_v41 }
  0x39   : > { %601 = vmatprep.subr.bf16.mxu0 %v971_v42  ;;  %642 = vmatprep.subr.bf16.mxu1 %v973_v43 }
  0x3c   : > { %602 = vmatpush1.bf16.msra.mxu0 %v975_v44  ;;  %643 = vmatpush1.bf16.msra.mxu1 %v976_v45 }
  0x3d   : > { %603 = vmatprep.subr.bf16.mxu0 %v977_v46  ;;  %644 = vmatprep.subr.bf16.mxu1 %v979_v47 }
  0x40   : > { %604 = vmatpush1.bf16.msra.mxu0 %v981_v48  ;;  %645 = vmatpush1.bf16.msra.mxu1 %v982_v49 }
  0x41   : > { %605 = vmatprep.subr.bf16.mxu0 %v983_v50  ;;  %646 = vmatprep.subr.bf16.mxu1 %v985_v51 }
  0x44   : > { %606 = vmatpush1.bf16.msra.mxu0 %v987_v52  ;;  %647 = vmatpush1.bf16.msra.mxu1 %v988_v53 }
  0x45   : > { %607 = vmatprep.subr.bf16.mxu0 %v989_v54  ;;  %648 = vmatprep.subr.bf16.mxu1 %v991_v55 }
  0x48   : > { %608 = vmatpush1.bf16.msra.mxu0 %v993_v56  ;;  %649 = vmatpush1.bf16.msra.mxu1 %v994_v57 }
  0x4b   : > { %614 = vmatmul.mubr.bf16.vlgmr.msra.gmra.mrb[0].mxu0 %v819_v58  ;;  %655 = vmatmul.mubr.bf16.vlgmr.msra.gmra.mrb[0].mxu1 %v819_v58 }
 0x11e   : > { %v615_v60 = vpop.f32.mrb[0].mxu0  ;;  %v656_v61 = vpop.f32.mrb[0].mxu1 }
 0x11f   : > { %v682_v62 = vmul.f32 %v615_v60, %v615_v60  ;;  %v617_v63 = vpop.f32.mrb[1].mxu0  ;;  %v658_v1 = vpop.f32.mrb[1].mxu1  ;;  %v684_v2 = vmul.f32 %v656_v61, %v656_v61 }
 0x120   : > { %v673_v3 = vadd.f32 %v617_v63, %v615_v60  ;;  %v683_v4 = vmul.f32 %v617_v63, %v617_v63  ;;  %v619_v5 = vpop.f32.mrb[2].mxu0  ;;  %v660_v0 = vpop.f32.mrb[2].mxu1  ;;  %v685_v11 = vmul.f32 %v658_v1, %v658_v1 }
 0x121   : > { %v620_v6 = vpop.f32.mrb[3].mxu0  ;;  %v661_v7 = vpop.f32.mrb[3].mxu1 }
 0x122   : > { %v674_v8 = vadd.f32 %v673_v3, %v656_v61  ;;  %v686_v9 = vadd.f32 %v683_v4, %v682_v62 }
 0x124   : > { %v675_v10 = vadd.f32 %v674_v8, %v658_v1  ;;  %v687_v12 = vadd.f32 %v686_v9, %v684_v2 }
 0x126   : > { %676 = vadd.xlane.f32.xlu0 %v675_v10  ;;  %v688_v13 = vadd.f32 %v687_v12, %v685_v11 }
 0x12a   : > { %689 = vadd.xlane.f32.xlu0 %v688_v13 }
 0x1b3   : > { %v677_v16 = vpop.xlane.xlu0 %676 }
 0x1b4   : > { %v678_v17 = vadd.f32 %v677_v16, %v672_v15 }
 0x1b6   : > { %680 = vst.msk [vmem:[#allocation2] sm:$0xff] %vm231_vm1, %v678_v17 }
 0x1b7   : > { %v690_v19 = vpop.xlane.xlu0 %689 }
 0x1b8   : > { %v691_v20 = vadd.f32 %v690_v19, %v681_v18 }
 0x1ba   : > { %692 = vst.msk [vmem:[#allocation3] sm:$0xff] %vm231_vm1, %v691_v20 }
 0x1bd   : > { %v696_v21 = vld [vmem:[#allocation2] sm:$0xff] }
 0x1be   : > { %v697_v22 = vmul.f32 0.001953125, %v696_v21 }
 0x1c0   : > { %v700_v25 = vmul.f32 %v697_v22, %v697_v22 }
 0x1c1   : > { %v698_v23 = vld [vmem:[#allocation3] sm:$0xff] }
 0x1c2   : > { %v699_v24 = vmul.f32 0.001953125, %v698_v23 }
 0x1c4   : > { %v701_v26 = vsub.f32 %v699_v24, %v700_v25 }
 0x1c6   : > { %v702_v27 = vmax.f32 %v701_v26, 0.0 }
 0x1c8   : > { %v703_v28 = vadd.f32 1e-05, %v702_v27 }
 0x1ca   : > { %997 = vrsqrt.f32 %v703_v28 }
 0x1d4   : > { %v998_v30 = vpop.eup %997 }
 0x1d5   : > { %v706_v31 = vmul.f32 %v998_v30, %v705_v29 }
 0x1d7   : > { %716 = vperm.xlu1 %909, %v706_v31   ;;  %v708_v33 = vmul.f32 %v706_v31, %v697_v22 }
 0x1d9   : > { %v709_v34 = vsub.f32 %v707_v32, %v708_v33 }
 0x1db   : > { %725 = vperm.xlu1 %909, %v709_v34  }
 0x256   : > { %v717_v35 = vpop.permute.xlu1 %716 }
 0x257   : > { %v719_v36 = vmul.f32 %v717_v35, %v615_v60  ;;  %v721_v37 = vmul.f32 %v717_v35, %v656_v61  ;;  %v722_v38 = vmul.f32 %v717_v35, %v658_v1  ;;  %v720_v39 = vmul.f32 %v717_v35, %v617_v63 }
 0x25a   : > { %v726_v40 = vpop.permute.xlu1 %725 }
 0x25b   : > { %v728_v41 = vadd.f32 %v726_v40, %v719_v36  ;;  %v729_v42 = vadd.f32 %v726_v40, %v720_v39  ;;  %v730_v43 = vadd.f32 %v726_v40, %v721_v37  ;;  %v731_v44 = vadd.f32 %v726_v40, %v722_v38 }
 0x25d   : > { %v732_v45 = vmax.f32 %v728_v41, 0.0  ;;  %v733_v46 = vmax.f32 %v729_v42, 0.0  ;;  %v734_v47 = vmax.f32 %v730_v43, 0.0  ;;  %v735_v48 = vmax.f32 %v731_v44, 0.0 }
 0x25f   : > { %736 = vst [vmem:[%s225_s6] sm:$0xff] %v732_v45  ;;  %737 = vst [vmem:[%s225_s6 + $0x8] sm:$0xff] %v733_v46 }
 0x260   : > { %738 = vst [vmem:[%s225_s6 + $0x10] sm:$0xff] %v734_v47  ;;  %739 = vst [vmem:[%s225_s6 + $0x18] sm:$0xff] %v735_v48 }
 0x261 PF: > { %s14_s17 = sadd.s32 1, %s1021_s17   ;;  %s1169_s15 = smov %s1017_s16 }
 0x262   : > { %p11_p5 = scmp.ge.s32.totalorder %s14_s17, 4   ;;  %s1170_s16 = smov %s1172_s18 }
 0x264   :  { %13 = sbr.rel (!%p11_p5) target bundleno = 2 (0x2), region = 75 }

</bundles_post_ra>
